<compile_context>
chip_gen: v6e
topology: v6e:2x2x1
jax: 0.10.0
libtpu: 0.0.40
codegen_flags: <defaults>
</compile_context>

<pallas_src>
import jax
import jax.numpy as jnp
from jax.experimental import pallas as pl
from jax.experimental.pallas import tpu as pltpu

BN_EPS = 1e-5
HIDDEN = 256          # fc1 output width
NUM_CAT = 26          # fc_cat output width
OUT_PAD = 128         # lane-dense padded output width (26 -> 128)
BLOCK_BUDGET = 4 << 20  # target real bytes per input block per grid step


def _emotic_kernel(ctx_ref, body_ref, w1c_ref, w1b_ref, b1_ref, w2_ref, b2_ref,
                   out_ref, ctx_acc, body_acc):
    s = pl.program_id(1)

    @pl.when(s == 0)
    def _():
        ctx_acc[...] = jnp.zeros_like(ctx_acc)
        body_acc[...] = jnp.zeros_like(body_acc)

    # "Backbone" stand-in: global average pool, accumulated as a running SUM
    # over the spatial (lane) axis.  The 1/HW scale is folded into fc1.
    ctx_acc[...] += jnp.sum(ctx_ref[...].astype(jnp.float32), axis=-1)
    body_acc[...] += jnp.sum(body_ref[...].astype(jnp.float32), axis=-1)

    @pl.when(s == pl.num_programs(1) - 1)
    def _():
        # fc1 over the fused features WITHOUT a concat: split matmul.
        # Eval-mode BatchNorm (running stats) + 1/HW are folded into
        # (w1c, w1b, b1), so fc1 + bn1 is just these two dots + bias.
        h = jnp.dot(ctx_acc[...], w1c_ref[...], preferred_element_type=jnp.float32)
        h += jnp.dot(body_acc[...], w1b_ref[...], preferred_element_type=jnp.float32)
        h += b1_ref[...]
        h = jnp.maximum(h, 0.0)          # relu
        # dropout(p=0.5): identity in eval mode.
        o = jnp.dot(h, w2_ref[...], preferred_element_type=jnp.float32)
        out_ref[...] = (o + b2_ref[...]).astype(out_ref.dtype)


def _choose_spatial_steps(hw_c, hw_b, cc, cb, n_min, itemsize):
    """Common spatial step count n_s s.t. both HW extents split exactly and
    every tile is lane-dense (multiple of 128) or the full extent."""
    def legal(n_s):
        if hw_c % n_s or hw_b % n_s:
            return False
        for t, hw in ((hw_c // n_s, hw_c), (hw_b // n_s, hw_b)):
            if t != hw and t % 128:
                return False
        return True

    def step_bytes(n_s):
        return n_min * max(cc * (hw_c // n_s), cb * (hw_b // n_s)) * itemsize

    best = 1
    for n_s in range(1, max(hw_c, hw_b) + 1):
        if not legal(n_s):
            continue
        best = n_s
        if step_bytes(n_s) <= BLOCK_BUDGET:
            break
    return best


def emotic_forward(images_context, images_body, params):
    """images_context: [N, Cc, H, W] NCHW ; images_body: [N, Cb, H, W] NCHW."""
    N, Cc, Hc, Wc = images_context.shape
    Nb, Cb, Hb, Wb = images_body.shape
    assert N == Nb
    hw_c, hw_b = Hc * Wc, Hb * Wb
    itemsize = jnp.dtype(images_context.dtype).itemsize

    # [N, C, H, W] -> [N, C, HW]: contiguous reshape only — no transpose, no
    # pad, no extra HBM traffic.  The kernel pools over the last (lane) axis.
    ctx = images_context.reshape(N, Cc, hw_c)
    body = images_body.reshape(N, Cb, hw_b)

    # ---- Tile selection (per-generation safe, HBM-bandwidth oriented). ----
    n_min = N if N < 8 else 8                     # legal minimum batch tile
    n_s = _choose_spatial_steps(hw_c, hw_b, Cc, Cb, n_min, itemsize)
    hw_tc, hw_tb = hw_c // n_s, hw_b // n_s

    per_row = max(Cc * hw_tc, Cb * hw_tb) * itemsize
    n_tile = min(N, 128, max(1, BLOCK_BUDGET // per_row))
    if n_tile < N:                                # partial tiling must be /8
        n_tile = max(8, (n_tile // 8) * 8)
    if N >= 16 and n_tile >= N:                   # >=2 batch tiles (megacore / v7x)
        n_tile = max(8, (((N + 1) // 2) // 8) * 8)
    # Keep double-buffered input blocks comfortably inside VMEM on all gens.
    while n_tile > n_min and 2 * n_tile * (Cc * hw_tc + Cb * hw_tb) * itemsize > (24 << 20):
        n_tile = max(n_min, n_tile - 8)
    n_b = pl.cdiv(N, n_tile)

    # ---- Fold eval-mode BatchNorm + 1/HW pooling scale into fc1 params. ----
    scale = params["gamma"] * jax.lax.rsqrt(params["rvar"] + BN_EPS)         # [1, 256]
    w1c = params["w1"][:Cc] * scale * (1.0 / float(hw_c))                    # [Cc, 256]
    w1b = params["w1"][Cc:] * scale * (1.0 / float(hw_b))                    # [Cb, 256]
    b1 = (params["b1"] - params["rmean"]) * scale + params["beta"]           # [1, 256]
    # Lane-pad fc_cat to 128 output columns (zeros), sliced back after the call.
    w2 = jnp.pad(params["w2"], ((0, 0), (0, OUT_PAD - NUM_CAT)))             # [256, 128]
    b2 = jnp.pad(params["b2"], ((0, 0), (0, OUT_PAD - NUM_CAT)))             # [1, 128]

    # ---- VMEM budget / cost hint. ----
    fixed_bytes = ((Cc + Cb) * HIDDEN + HIDDEN + HIDDEN * OUT_PAD + OUT_PAD) * 4
    blk_in = 2 * n_tile * (Cc * hw_tc + Cb * hw_tb) * itemsize               # 2 bufs
    blk_out = 2 * n_tile * OUT_PAD * 4
    scratch_bytes = n_tile * (Cc + Cb) * 4
    vmem_limit = int(min(max(2 * (blk_in + 2 * fixed_bytes + blk_out + scratch_bytes),
                             16 << 20), 48 << 20))

    cost = pl.CostEstimate(
        flops=int(N * (Cc * hw_c + Cb * hw_b)            # pooling adds
                  + 2 * N * (Cc + Cb) * HIDDEN           # fc1
                  + 2 * N * HIDDEN * OUT_PAD),           # fc_cat
        transcendentals=0,
        bytes_accessed=int((ctx.size + body.size) * itemsize
                           + fixed_bytes + N * OUT_PAD * 4),
    )

    out = pl.pallas_call(
        _emotic_kernel,
        out_shape=jax.ShapeDtypeStruct((N, OUT_PAD), jnp.float32),
        grid_spec=pltpu.PrefetchScalarGridSpec(
            num_scalar_prefetch=0,
            grid=(n_b, n_s),                              # (batch, spatial reduction)
            in_specs=[
                pl.BlockSpec((n_tile, Cc, hw_tc), lambda n, s: (n, 0, s)),
                pl.BlockSpec((n_tile, Cb, hw_tb), lambda n, s: (n, 0, s)),
                pl.BlockSpec((Cc, HIDDEN), lambda n, s: (0, 0)),   # small weights:
                pl.BlockSpec((Cb, HIDDEN), lambda n, s: (0, 0)),   # VMEM residents
                pl.BlockSpec((1, HIDDEN), lambda n, s: (0, 0)),
                pl.BlockSpec((HIDDEN, OUT_PAD), lambda n, s: (0, 0)),
                pl.BlockSpec((1, OUT_PAD), lambda n, s: (0, 0)),
            ],
            out_specs=pl.BlockSpec((n_tile, OUT_PAD), lambda n, s: (n, 0)),
            scratch_shapes=[
                pltpu.VMEM((n_tile, Cc), jnp.float32),   # pooled ctx sum
                pltpu.VMEM((n_tile, Cb), jnp.float32),   # pooled body sum
            ],
        ),
        compiler_params=pltpu.CompilerParams(
            dimension_semantics=("parallel", "arbitrary"),
            vmem_limit_bytes=vmem_limit,
        ),
        cost_estimate=cost,
    )(ctx, body, w1c, w1b, b1, w2, b2)

    return out[:, :NUM_CAT]


def init_params(key, num_context_features, num_body_features):
    in_dim = num_context_features + num_body_features
    k1, k2, k3, k4, k5, k6 = jax.random.split(key, 6)
    # Linear weights stored already transposed ([in, out]) for the MXU matmul.
    w1 = jax.random.normal(k1, (in_dim, HIDDEN), jnp.float32) * 0.05
    b1 = jax.random.normal(k2, (1, HIDDEN), jnp.float32) * 0.01
    w2 = jax.random.normal(k3, (HIDDEN, NUM_CAT), jnp.float32) * 0.05
    b2 = jax.random.normal(k4, (1, NUM_CAT), jnp.float32) * 0.01
    gamma = 1.0 + 0.1 * jax.random.normal(k5, (1, HIDDEN), jnp.float32)
    beta = 0.1 * jax.random.normal(k6, (1, HIDDEN), jnp.float32)
    rmean = jnp.zeros((1, HIDDEN), jnp.float32)
    rvar = jnp.ones((1, HIDDEN), jnp.float32)
    return dict(w1=w1, b1=b1, w2=w2, b2=b2,
                gamma=gamma, beta=beta, rmean=rmean, rvar=rvar)


def reference_forward(images_context, images_body, params):
    """Plain-JAX reference with the original (unfolded) eval-mode semantics."""
    N = images_context.shape[0]
    ctx_feat = jnp.mean(images_context.reshape(N, images_context.shape[1], -1), axis=-1)
    body_feat = jnp.mean(images_body.reshape(N, images_body.shape[1], -1), axis=-1)
    fuse = jnp.concatenate([ctx_feat, body_feat], axis=1)
    h = fuse @ params["w1"] + params["b1"]
    h = (h - params["rmean"]) / jnp.sqrt(params["rvar"] + BN_EPS) * params["gamma"] + params["beta"]
    h = jnp.maximum(h, 0.0)
    return h @ params["w2"] + params["b2"]


if __name__ == "__main__":
    key = jax.random.PRNGKey(0)
    k_ctx, k_body, k_par = jax.random.split(key, 3)

    # Small deterministic example inputs (NCHW).
    N, Cc, Cb, H, W = 2, 32, 32, 16, 16
    images_context = jax.random.normal(k_ctx, (N, Cc, H, W), jnp.float32)
    images_body = jax.random.normal(k_body, (N, Cb, H, W), jnp.float32)

    params = init_params(k_par, num_context_features=Cc, num_body_features=Cb)

    out = emotic_forward(images_context, images_body, params)
    out = jax.block_until_ready(out)

    ref = reference_forward(images_context, images_body, params)
    assert out.shape == (N, NUM_CAT)
    assert jnp.allclose(out, ref, atol=1e-4, rtol=1e-4), "mismatch vs reference"

    print("KERNEL_OK")
</pallas_src>

<mosaic_0001>
module attributes {stable_mosaic.version = 11 : i64} {
  func.func @_emotic_kernel(%arg0: i32, %arg1: i32, %arg2: memref<2x32x256xf32, #tpu.memory_space<vmem>>, %arg3: memref<2x32x256xf32, #tpu.memory_space<vmem>>, %arg4: memref<32x256xf32, #tpu.memory_space<vmem>>, %arg5: memref<32x256xf32, #tpu.memory_space<vmem>>, %arg6: memref<1x256xf32, #tpu.memory_space<vmem>>, %arg7: memref<256x128xf32, #tpu.memory_space<vmem>>, %arg8: memref<1x128xf32, #tpu.memory_space<vmem>>, %arg9: memref<2x128xf32, #tpu.memory_space<vmem>>, %arg10: memref<2x32xf32, #tpu.memory_space<vmem>>, %arg11: memref<2x32xf32, #tpu.memory_space<vmem>>) attributes {dimension_semantics = [#tpu.dimension_semantics<parallel>, #tpu.dimension_semantics<arbitrary>], iteration_bounds = array<i64: 1, 1>, scalar_prefetch = 0 : i64, scratch_operands = 2 : i64, tpu.core_type = #tpu.core_type<tc>, window_params = [{transform_indices = @transform_0, window_bounds = array<i64: 2, 32, 256>}, {transform_indices = @transform_1, window_bounds = array<i64: 2, 32, 256>}, {pipeline_mode = #tpu.pipeline_mode<synchronous>, transform_indices = @transform_2, window_bounds = array<i64: 32, 256>}, {pipeline_mode = #tpu.pipeline_mode<synchronous>, transform_indices = @transform_3, window_bounds = array<i64: 32, 256>}, {pipeline_mode = #tpu.pipeline_mode<synchronous>, transform_indices = @transform_4, window_bounds = array<i64: 1, 256>}, {pipeline_mode = #tpu.pipeline_mode<synchronous>, transform_indices = @transform_5, window_bounds = array<i64: 256, 128>}, {pipeline_mode = #tpu.pipeline_mode<synchronous>, transform_indices = @transform_6, window_bounds = array<i64: 1, 128>}, {transform_indices = @transform_7, window_bounds = array<i64: 2, 128>}]} {
    %c0_i32 = arith.constant 0 : i32
    %0 = arith.cmpi eq, %arg1, %c0_i32 : i32
    %1 = arith.extui %0 : i1 to i32
    %c0_i32_0 = arith.constant 0 : i32
    %2 = arith.cmpi ne, %1, %c0_i32_0 : i32
    scf.if %2 {
      %cst_17 = arith.constant 0.000000e+00 : f32
      %16 = vector.broadcast %cst_17 : f32 to vector<2x32xf32>
      %c0_18 = arith.constant 0 : index
      %c0_19 = arith.constant 0 : index
      %17 = vector.load %arg10[%c0_18, %c0_19] : memref<2x32xf32, #tpu.memory_space<vmem>>, vector<2x32xf32>
      tpu.vector_store %arg10[%c0_18, %c0_19], %16 {strides = array<i32>} : memref<2x32xf32, #tpu.memory_space<vmem>>, vector<2x32xf32>,
      %cst_20 = arith.constant 0.000000e+00 : f32
      %18 = vector.broadcast %cst_20 : f32 to vector<2x32xf32>
      %c0_21 = arith.constant 0 : index
      %c0_22 = arith.constant 0 : index
      %19 = vector.load %arg11[%c0_21, %c0_22] : memref<2x32xf32, #tpu.memory_space<vmem>>, vector<2x32xf32>
      tpu.vector_store %arg11[%c0_21, %c0_22], %18 {strides = array<i32>} : memref<2x32xf32, #tpu.memory_space<vmem>>, vector<2x32xf32>,
    } else {
    }
    %c0 = arith.constant 0 : index
    %c0_1 = arith.constant 0 : index
    %3 = vector.load %arg10[%c0, %c0_1] : memref<2x32xf32, #tpu.memory_space<vmem>>, vector<2x32xf32>
    %c0_2 = arith.constant 0 : index
    %c0_3 = arith.constant 0 : index
    %c0_4 = arith.constant 0 : index
    %4 = vector.load %arg2[%c0_2, %c0_3, %c0_4] : memref<2x32x256xf32, #tpu.memory_space<vmem>>, vector<2x32x256xf32>
    %cst = arith.constant dense<0.000000e+00> : vector<2x32xf32>
    %5 = vector.multi_reduction <add>, %4, %cst [2] : vector<2x32x256xf32> to vector<2x32xf32>
    %6 = arith.addf %3, %5 : vector<2x32xf32>
    %c0_5 = arith.constant 0 : index
    %c0_6 = arith.constant 0 : index
    %7 = vector.load %arg10[%c0_5, %c0_6] : memref<2x32xf32, #tpu.memory_space<vmem>>, vector<2x32xf32>
    tpu.vector_store %arg10[%c0_5, %c0_6], %6 {strides = array<i32>} : memref<2x32xf32, #tpu.memory_space<vmem>>, vector<2x32xf32>,
    %c0_7 = arith.constant 0 : index
    %c0_8 = arith.constant 0 : index
    %8 = vector.load %arg11[%c0_7, %c0_8] : memref<2x32xf32, #tpu.memory_space<vmem>>, vector<2x32xf32>
    %c0_9 = arith.constant 0 : index
    %c0_10 = arith.constant 0 : index
    %c0_11 = arith.constant 0 : index
    %9 = vector.load %arg3[%c0_9, %c0_10, %c0_11] : memref<2x32x256xf32, #tpu.memory_space<vmem>>, vector<2x32x256xf32>
    %cst_12 = arith.constant dense<0.000000e+00> : vector<2x32xf32>
    %10 = vector.multi_reduction <add>, %9, %cst_12 [2] : vector<2x32x256xf32> to vector<2x32xf32>
    %11 = arith.addf %8, %10 : vector<2x32xf32>
    %c0_13 = arith.constant 0 : index
    %c0_14 = arith.constant 0 : index
    %12 = vector.load %arg11[%c0_13, %c0_14] : memref<2x32xf32, #tpu.memory_space<vmem>>, vector<2x32xf32>
    tpu.vector_store %arg11[%c0_13, %c0_14], %11 {strides = array<i32>} : memref<2x32xf32, #tpu.memory_space<vmem>>, vector<2x32xf32>,
    %c0_i32_15 = arith.constant 0 : i32
    %13 = arith.cmpi eq, %arg1, %c0_i32_15 : i32
    %14 = arith.extui %13 : i1 to i32
    %c0_i32_16 = arith.constant 0 : i32
    %15 = arith.cmpi ne, %14, %c0_i32_16 : i32
    scf.if %15 {
      %c0_17 = arith.constant 0 : index
      %c0_18 = arith.constant 0 : index
      %16 = vector.load %arg10[%c0_17, %c0_18] : memref<2x32xf32, #tpu.memory_space<vmem>>, vector<2x32xf32>
      %c0_19 = arith.constant 0 : index
      %c0_20 = arith.constant 0 : index
      %17 = vector.load %arg4[%c0_19, %c0_20] : memref<32x256xf32, #tpu.memory_space<vmem>>, vector<32x256xf32>
      %cst_21 = arith.constant dense<0.000000e+00> : vector<2x256xf32>
      %18 = tpu.matmul %16, %17, %cst_21 {dimension_numbers = #tpu.dot_dimension_numbers<[1], [0], [0], [1], [0, 0, 1, 1], [], []>} : vector<2x32xf32>, vector<32x256xf32>, vector<2x256xf32> -> vector<2x256xf32>
      %c0_22 = arith.constant 0 : index
      %c0_23 = arith.constant 0 : index
      %19 = vector.load %arg11[%c0_22, %c0_23] : memref<2x32xf32, #tpu.memory_space<vmem>>, vector<2x32xf32>
      %c0_24 = arith.constant 0 : index
      %c0_25 = arith.constant 0 : index
      %20 = vector.load %arg5[%c0_24, %c0_25] : memref<32x256xf32, #tpu.memory_space<vmem>>, vector<32x256xf32>
      %cst_26 = arith.constant dense<0.000000e+00> : vector<2x256xf32>
      %21 = tpu.matmul %19, %20, %cst_26 {dimension_numbers = #tpu.dot_dimension_numbers<[1], [0], [0], [1], [0, 0, 1, 1], [], []>} : vector<2x32xf32>, vector<32x256xf32>, vector<2x256xf32> -> vector<2x256xf32>
      %22 = arith.addf %18, %21 : vector<2x256xf32>
      %c0_27 = arith.constant 0 : index
      %c0_28 = arith.constant 0 : index
      %23 = vector.load %arg6[%c0_27, %c0_28] : memref<1x256xf32, #tpu.memory_space<vmem>>, vector<1x256xf32>
      %24 = vector.broadcast %23 : vector<1x256xf32> to vector<2x256xf32>
      %25 = arith.addf %22, %24 : vector<2x256xf32>
      %cst_29 = arith.constant 0.000000e+00 : f32
      %26 = vector.broadcast %cst_29 : f32 to vector<2x256xf32>
      %27 = arith.maximumf %25, %26 : vector<2x256xf32>
      %c0_30 = arith.constant 0 : index
      %c0_31 = arith.constant 0 : index
      %28 = vector.load %arg7[%c0_30, %c0_31] : memref<256x128xf32, #tpu.memory_space<vmem>>, vector<256x128xf32>
      %cst_32 = arith.constant dense<0.000000e+00> : vector<2x128xf32>
      %29 = tpu.matmul %27, %28, %cst_32 {dimension_numbers = #tpu.dot_dimension_numbers<[1], [0], [0], [1], [0, 0, 1, 1], [], []>} : vector<2x256xf32>, vector<256x128xf32>, vector<2x128xf32> -> vector<2x128xf32>
      %c0_33 = arith.constant 0 : index
      %c0_34 = arith.constant 0 : index
      %30 = vector.load %arg8[%c0_33, %c0_34] : memref<1x128xf32, #tpu.memory_space<vmem>>, vector<1x128xf32>
      %31 = vector.broadcast %30 : vector<1x128xf32> to vector<2x128xf32>
      %32 = arith.addf %29, %31 : vector<2x128xf32>
      %c0_35 = arith.constant 0 : index
      %c0_36 = arith.constant 0 : index
      %33 = vector.load %arg9[%c0_35, %c0_36] : memref<2x128xf32, #tpu.memory_space<vmem>>, vector<2x128xf32>
      tpu.vector_store %arg9[%c0_35, %c0_36], %32 {strides = array<i32>} : memref<2x128xf32, #tpu.memory_space<vmem>>, vector<2x128xf32>,
    } else {
    }
    return
  }
  func.func @transform_0(%arg0: i32, %arg1: i32) -> (i32, i32, i32) {
    %c0_i32 = arith.constant 0 : i32
    %c0_i32_0 = arith.constant 0 : i32
    return %arg0, %c0_i32, %arg1 : i32, i32, i32
  }
  func.func @transform_1(%arg0: i32, %arg1: i32) -> (i32, i32, i32) {
    %c0_i32 = arith.constant 0 : i32
    %c0_i32_0 = arith.constant 0 : i32
    return %arg0, %c0_i32, %arg1 : i32, i32, i32
  }
  func.func @transform_2(%arg0: i32, %arg1: i32) -> (i32, i32) {
    %c0_i32 = arith.constant 0 : i32
    %c0_i32_0 = arith.constant 0 : i32
    %c0_i32_1 = arith.constant 0 : i32
    return %c0_i32, %c0_i32_0 : i32, i32
  }
  func.func @transform_3(%arg0: i32, %arg1: i32) -> (i32, i32) {
    %c0_i32 = arith.constant 0 : i32
    %c0_i32_0 = arith.constant 0 : i32
    %c0_i32_1 = arith.constant 0 : i32
    return %c0_i32, %c0_i32_0 : i32, i32
  }
  func.func @transform_4(%arg0: i32, %arg1: i32) -> (i32, i32) {
    %c0_i32 = arith.constant 0 : i32
    %c0_i32_0 = arith.constant 0 : i32
    %c0_i32_1 = arith.constant 0 : i32
    return %c0_i32, %c0_i32_0 : i32, i32
  }
  func.func @transform_5(%arg0: i32, %arg1: i32) -> (i32, i32) {
    %c0_i32 = arith.constant 0 : i32
    %c0_i32_0 = arith.constant 0 : i32
    %c0_i32_1 = arith.constant 0 : i32
    return %c0_i32, %c0_i32_0 : i32, i32
  }
  func.func @transform_6(%arg0: i32, %arg1: i32) -> (i32, i32) {
    %c0_i32 = arith.constant 0 : i32
    %c0_i32_0 = arith.constant 0 : i32
    %c0_i32_1 = arith.constant 0 : i32
    return %c0_i32, %c0_i32_0 : i32, i32
  }
  func.func @transform_7(%arg0: i32, %arg1: i32) -> (i32, i32) {
    %c0_i32 = arith.constant 0 : i32
    %c0_i32_0 = arith.constant 0 : i32
    return %arg0, %c0_i32 : i32, i32
  }
}

</mosaic_0001>

<bundles_post_ra>
// kernel: tpu_custom_call.1
= control target key start
LH: loop header
LB: loop body
LE: loop exit
PB: predicated region body
PF: predicated region fallthrough
CT: control target
= control target key end

     0   :  { %12 = vsyncpa [#allocation5], 0  ;;  %s903_s0 = inlined_call_operand.hbm [shape: f32[2,32,256], index: 0, kind: input, shape index: {}]   ;;  %s904_s1 = inlined_call_operand.hbm [shape: f32[2,32,256], index: 1, kind: input, shape index: {}]   ;;  %s905_s2 = inlined_call_operand.hbm [shape: f32[32,256], index: 2, kind: input, shape index: {}]   ;;  %s906_s3 = inlined_call_operand.hbm [shape: f32[32,256], index: 3, kind: input, shape index: {}]   ;;  %s907_s4 = inlined_call_operand.vmem [shape: f32[1,256], index: 4, kind: input, shape index: {}]   ;;  %s908_s5 = inlined_call_operand.hbm [shape: f32[256,128], index: 5, kind: input, shape index: {}]   ;;  %s909_s6 = inlined_call_operand.vmem [shape: f32[1,128], index: 6, kind: input, shape index: {}]   ;;  %s910_s7 = inlined_call_operand.hbm [shape: f32[2,128], index: 7, kind: output, shape index: {}]  }
   0x1   :  { %13 = vsyncpa [#allocation8], 0 }
   0x2   :  { %14 = vsyncpa [#allocation11], 0 }
   0x3   :  { %15 = vsyncpa [#allocation6], 0  ;;  %s784_s24 = smov [#allocation7]   ;;  %s785_s26 = smov [#allocation10]  }
   0x4   :  { %s33_s25 = sshll.u32 %s784_s24, 4  ;;  %s57_s27 = sshll.u32 %s785_s26, 4  ;;  %s34_s25 = int_to_ptr.vmem [resolvable:$true] %s33_s25  ;;  %s58_s27 = int_to_ptr.vmem [resolvable:$true] %s57_s27 }
   0x5   :  { %s664_s28 = scalar_lea.vmem %s34_s25, 2048  ;;  %p669_p1 = scmp.lt.s32.totalorder %s34_s25, %s34_s25 }
   0x6   :  { %p665_p0 = scmp.ne.s32.totalorder %s34_s25, %s664_s28  ;;  %p670_p2 = scmp.lt.s32.totalorder %s664_s28, %s664_s28 }
   0x8   :  { %p671_p3 = por %p670_p2, %p669_p1 }
   0xa   :  { %p672_p4 = pnand %p671_p3, %p665_p0 }
   0xc   :  { %675 = shalt.err (!%p672_p4)
}
   0xd   :  { %s786_s29 = smov 256   ;;  %s787_s30 = smov 16  }
   0xe   :  { %39 = dma.hbm_to_vmem [thread:$0]  %s904_s1, 2048, %s34_s25, [#allocation8], %s786_s29, %s786_s29, %s787_s30  }
   0xf   :  { %s684_s10 = scalar_lea.vmem %s58_s27, 1024  ;;  %p689_p6 = scmp.lt.s32.totalorder %s58_s27, %s58_s27 }
  0x10   :  { %p685_p5 = scmp.ne.s32.totalorder %s58_s27, %s684_s10  ;;  %p690_p7 = scmp.lt.s32.totalorder %s684_s10, %s684_s10 }
  0x12   :  { %p691_p8 = por %p690_p7, %p689_p6 }
  0x14   :  { %p692_p9 = pnand %p691_p8, %p685_p5 }
  0x16   :  { %695 = shalt.err (!%p692_p9)
}
  0x17   :  { %63 = dma.hbm_to_vmem [thread:$0]  %s906_s3, 1024, %s58_s27, [#allocation11], %s786_s29, %s786_s29, %s787_s30  }
  0x18   :  { %s788_s13 = smov [#allocation4]   ;;  %s789_s15 = smov [#allocation9]  }
  0x19   :  { %s21_s14 = sshll.u32 %s788_s13, 4  ;;  %s45_s16 = sshll.u32 %s789_s15, 4  ;;  %s22_s14 = int_to_ptr.vmem [resolvable:$true] %s21_s14  ;;  %s46_s16 = int_to_ptr.vmem [resolvable:$true] %s45_s16 }
  0x1a   :  { %s704_s1 = scalar_lea.vmem %s22_s14, 2048  ;;  %p709_p11 = scmp.lt.s32.totalorder %s22_s14, %s22_s14 }
  0x1b   :  { %p705_p10 = scmp.ne.s32.totalorder %s22_s14, %s704_s1  ;;  %p710_p12 = scmp.lt.s32.totalorder %s704_s1, %s704_s1 }
  0x1d   :  { %p711_p13 = por %p710_p12, %p709_p11 }
  0x1f   :  { %p712_p0 = pnand %p711_p13, %p705_p10 }
  0x21   :  { %715 = shalt.err (!%p712_p0)
}
  0x22   :  { %27 = dma.hbm_to_vmem [thread:$0]  %s903_s0, 2048, %s22_s14, [#allocation5], %s786_s29, %s786_s29, %s787_s30  }
  0x23   :  { %s724_s3 = scalar_lea.vmem %s46_s16, 1024  ;;  %p729_p2 = scmp.lt.s32.totalorder %s46_s16, %s46_s16 }
  0x24   :  { %p725_p1 = scmp.ne.s32.totalorder %s46_s16, %s724_s3  ;;  %p730_p3 = scmp.lt.s32.totalorder %s724_s3, %s724_s3 }
  0x26   :  { %p731_p4 = por %p730_p3, %p729_p2 }
  0x28   :  { %p732_p5 = pnand %p731_p4, %p725_p1 }
  0x2a   :  { %735 = shalt.err (!%p732_p5)
}
  0x2b   :  { %51 = dma.hbm_to_vmem [thread:$0]  %s905_s2, 1024, %s46_s16, [#allocation8], %s786_s29, %s786_s29, %s787_s30  }
  0x2c   :  { %s790_s21 = smov [#allocation12]  }
  0x2d   :  { %s71_s22 = sshll.u32 %s790_s21, 4  ;;  %s72_s22 = int_to_ptr.vmem [resolvable:$true] %s71_s22 }
  0x2e   :  { %s744_s23 = scalar_lea.vmem %s72_s22, 4096  ;;  %p749_p7 = scmp.lt.s32.totalorder %s72_s22, %s72_s22 }
  0x2f   :  { %p745_p6 = scmp.ne.s32.totalorder %s72_s22, %s744_s23  ;;  %p750_p8 = scmp.lt.s32.totalorder %s744_s23, %s744_s23 }
  0x31   :  { %p751_p9 = por %p750_p8, %p749_p7 }
  0x33   :  { %p752_p10 = pnand %p751_p9, %p745_p6 }
  0x35   :  { %755 = shalt.err (!%p752_p10)
}
  0x36   :  { %s791_s0 = smov 128   ;;  %s792_s24 = smov 8  }
  0x37   :  { %77 = dma.hbm_to_vmem [thread:$0]  %s908_s5, 4096, %s72_s22, [#allocation11], %s791_s0, %s791_s0, %s792_s24  }
  0x38   :  { %776 = dma.done.wait [#allocation5], 2048  }
  0x39   :  { %777 = vsyncadd [#allocation5], 4294965248 }
  0x3a   :  { %778 = dma.done.wait [#allocation8], 3072  }
  0x3b   :  { %779 = vsyncadd [#allocation8], 4294964224 }
  0x3c   :  { %780 = dma.done.wait [#allocation11], 5120  }
  0x3d   :  { %781 = vsyncadd [#allocation11], 4294962176  ;;  %v212_v0 = vld [vmem:[#allocation7 + $0x40] sm:$0xff]  ;;  %v213_v1 = vld [vmem:[#allocation7 + $0x48] sm:$0xff]  ;;  %vm99_vm0 = vcmask 254976   ;;  %v793_v40 = vmov 0.0  }
  0x3e   :  { %v204_v2 = vld [vmem:[#allocation7] sm:$0xff]  ;;  %v232_v3 = vadd.f32 %v213_v1, %v212_v0  ;;  %v205_v4 = vld [vmem:[#allocation7 + $0x8] sm:$0xff]  ;;  %v214_v5 = vld [vmem:[#allocation7 + $0x50] sm:$0xff]  ;;  %100 = vst.msk [vmem:[#allocation2] sm:$0x3] %vm99_vm0, %v793_v40  ;;  %383 = vmatprep.mubr.f32.mxu1 %v793_v40  ;;  %v151_v0 = vlaneseq  ;;  %vm162_vm1 = vcmask 130112  }
  0x3f   :  { %v215_v6 = vld [vmem:[#allocation7 + $0x58] sm:$0xff]  ;;  %v220_v7 = vadd.f32 %v205_v4, %v204_v2  ;;  %v206_v8 = vld [vmem:[#allocation7 + $0x10] sm:$0xff]  ;;  %v216_v12 = vld [vmem:[#allocation7 + $0x60] sm:$0xff]  ;;  %101 = vst.msk [vmem:[#allocation3] sm:$0x3] %vm99_vm0, %v793_v40  ;;  %vm169_vm2 = vcmask 195712  }
  0x40   :  { %v207_v9 = vld [vmem:[#allocation7 + $0x18] sm:$0xff]  ;;  %233 = vadd.xlane.f32.xlu1 %v232_v3  ;;  %v235_v10 = vadd.f32 %v215_v6, %v214_v5  ;;  %v217_v13 = vld [vmem:[#allocation7 + $0x68] sm:$0xff]  ;;  %v208_v14 = vld [vmem:[#allocation7 + $0x20] sm:$0xff]  ;;  %v152_v1 = vand.u32 127, %v151_v0  ;;  %v867_v6 = vshrl.u32 %v151_v0, 7  ;;  %vm176_vm3 = vcmask 261312  }
  0x41   :  { %221 = vadd.xlane.f32.xlu0 %v220_v7  ;;  %v223_v11 = vadd.f32 %v207_v9, %v206_v8  ;;  %v209_v15 = vld [vmem:[#allocation7 + $0x28] sm:$0xff]  ;;  %v238_v16 = vadd.f32 %v217_v13, %v216_v12  ;;  %v218_v18 = vld [vmem:[#allocation7 + $0x70] sm:$0xff]  ;;  %v219_v19 = vld [vmem:[#allocation7 + $0x78] sm:$0xff]  ;;  %vm197_vm4 = vcmask 1041409   ;;  %vm315_vm5 = vcmask 261120  }
  0x42   :  { %v226_v17 = vadd.f32 %v209_v15, %v208_v14  ;;  %v210_v20 = vld [vmem:[#allocation7 + $0x30] sm:$0xff]  ;;  %v211_v21 = vld [vmem:[#allocation7 + $0x38] sm:$0xff]  ;;  %v241_v22 = vadd.f32 %v219_v19, %v218_v18  ;;  %v103_v26 = vld [vmem:[#allocation4] sm:$0xff]  ;;  %v157_v4 = vadd.s32 4294967288, %v152_v1  ;;  %v164_v5 = vadd.s32 4294967280, %v152_v1 }
  0x43   :  { %v229_v23 = vadd.f32 %v211_v21, %v210_v20  ;;  %v105_v24 = vld [vmem:[#allocation4 + $0x10] sm:$0xff]  ;;  %v106_v25 = vld [vmem:[#allocation4 + $0x18] sm:$0xff]  ;;  %v104_v27 = vld [vmem:[#allocation4 + $0x8] sm:$0xff]  ;;  %v155_v12 = vsub.s32 %v152_v1, %v867_v6 }
  0x44   :  { %236 = vadd.xlane.f32.xlu1 %v235_v10  ;;  %v122_v28 = vadd.f32 %v106_v25, %v105_v24  ;;  %v119_v29 = vadd.f32 %v104_v27, %v103_v26  ;;  %v113_v30 = vld [vmem:[#allocation4 + $0x50] sm:$0xff]  ;;  %v114_v31 = vld [vmem:[#allocation4 + $0x58] sm:$0xff]  ;;  %v111_v32 = vld [vmem:[#allocation4 + $0x40] sm:$0xff]  ;;  %v160_v8 = vsub.s32 %v157_v4, %v867_v6  ;;  %v171_v10 = vadd.s32 4294967272, %v152_v1 }
  0x45   :  { %224 = vadd.xlane.f32.xlu0 %v223_v11  ;;  %v112_v33 = vld [vmem:[#allocation4 + $0x48] sm:$0xff]  ;;  %v134_v34 = vadd.f32 %v114_v31, %v113_v30  ;;  %v115_v36 = vld [vmem:[#allocation4 + $0x60] sm:$0xff]  ;;  %v117_v43 = vld [vmem:[#allocation4 + $0x70] sm:$0xff]  ;;  %v167_v11 = vsub.s32 %v164_v5, %v867_v6 }
  0x46   :  { %v131_v35 = vadd.f32 %v112_v33, %v111_v32  ;;  %v116_v37 = vld [vmem:[#allocation4 + $0x68] sm:$0xff]  ;;  %v107_v38 = vld [vmem:[#allocation4 + $0x20] sm:$0xff]  ;;  %v118_v44 = vld [vmem:[#allocation4 + $0x78] sm:$0xff] }
  0x47   :  { %v108_v39 = vld [vmem:[#allocation4 + $0x28] sm:$0xff]  ;;  %v137_v41 = vadd.f32 %v116_v37, %v115_v36  ;;  %v109_v45 = vld [vmem:[#allocation4 + $0x30] sm:$0xff]  ;;  %v110_v46 = vld [vmem:[#allocation4 + $0x38] sm:$0xff]  ;;  %v140_v47 = vadd.f32 %v118_v44, %v117_v43 }
  0x48   :  { %239 = vadd.xlane.f32.xlu1 %v238_v16  ;;  %v125_v42 = vadd.f32 %v108_v39, %v107_v38  ;;  %v128_v48 = vadd.f32 %v110_v46, %v109_v45  ;;  %v314_v49 = vld [vmem:[#allocation10 + $0x38] sm:$0xff]  ;;  %v313_v50 = vld [vmem:[#allocation10 + $0x30] sm:$0xff]  ;;  %v312_v51 = vld [vmem:[#allocation10 + $0x28] sm:$0xff]  ;;  %v174_v16 = vsub.s32 %v171_v10, %v867_v6 }
  0x49   :  { %227 = vadd.xlane.f32.xlu0 %v226_v17  ;;  %343 = vmatprep.subr.mxu1 %v314_v49  ;;  %v311_v52 = vld [vmem:[#allocation10 + $0x20] sm:$0xff]  ;;  %v310_v53 = vld [vmem:[#allocation10 + $0x18] sm:$0xff]  ;;  %v309_v54 = vld [vmem:[#allocation10 + $0x10] sm:$0xff] }
  0x4a   :  { %344 = vmatpush1.msra.mxu1 %v313_v50  ;;  %v308_v55 = vld [vmem:[#allocation10 + $0x8] sm:$0xff]  ;;  %v307_v56 = vld [vmem:[#allocation10] sm:$0xff]  ;;  %v305_v57 = vld [vmem:[#allocation9 + $0x38] sm:$0xff] }
  0x4b   :  { %345 = vmatprep.subr.mxu1 %v312_v51  ;;  %v511_v58 = vld [vmem:[#allocation12 + $0xf8] sm:$0xff]  ;;  %v510_v60 = vld [vmem:[#allocation12 + $0xf0] sm:$0xff]  ;;  %v509_v62 = vld [vmem:[#allocation12 + $0xe8] sm:$0xff] }
  0x4c   :  { %242 = vadd.xlane.f32.xlu1 %v241_v22  ;;  %346 = vmatpush1.msra.mxu1 %v311_v52  ;;  %v495_v59 = vld [vmem:[#allocation12 + $0x78] sm:$0xff]  ;;  %v494_v61 = vld [vmem:[#allocation12 + $0x70] sm:$0xff]  ;;  %v493_v63 = vld [vmem:[#allocation12 + $0x68] sm:$0xff] }
  0x4d   :  { %230 = vadd.xlane.f32.xlu0 %v229_v23  ;;  %347 = vmatprep.subr.mxu1 %v310_v53  ;;  %v203_v31 = vld [vmem:[#allocation3] sm:$0x3]  ;;  %v303_v50 = vld [vmem:[#allocation9 + $0x28] sm:$0xff]  ;;  %v302_v52 = vld [vmem:[#allocation9 + $0x20] sm:$0xff] }
  0x4e   :  { %348 = vmatpush1.msra.mxu1 %v309_v54  ;;  %610 = vmatprep.subr.mxu0 %v511_v58  ;;  %v299_v0 = vld [vmem:[#allocation9 + $0x8] sm:$0xff]  ;;  %v508_v5 = vld [vmem:[#allocation12 + $0xe0] sm:$0xff]  ;;  %v506_v10 = vld [vmem:[#allocation12 + $0xd0] sm:$0xff] }
  0x4f   :  { %349 = vmatprep.subr.mxu1 %v308_v55  ;;  %611 = vmatpush3.msra.mxu0 %v495_v59 }
  0x50   :  { %123 = vadd.xlane.f32.xlu1 %v122_v28  ;;  %350 = vmatpush1.msra.mxu1 %v307_v56  ;;  %v301_v56 = vld [vmem:[#allocation9 + $0x18] sm:$0xff] }
  0x51   :  { %120 = vadd.xlane.f32.xlu0 %v119_v29  ;;  %417 = vmatprep.subr.mxu1 %v305_v57 }
  0x52   :  { %612 = vmatprep.subr.mxu0 %v510_v60  ;;  %v300_v60 = vld [vmem:[#allocation9 + $0x10] sm:$0xff] }
  0x53   :  { %613 = vmatpush3.msra.mxu0 %v494_v61 }
  0x54   :  { %135 = vadd.xlane.f32.xlu1 %v134_v34  ;;  %614 = vmatprep.subr.mxu0 %v509_v62 }
  0x55   :  { %132 = vadd.xlane.f32.xlu0 %v131_v35  ;;  %615 = vmatpush3.msra.mxu0 %v493_v63  ;;  %v102_v63 = vld [vmem:[#allocation2] sm:$0x3] }
  0x56   :  { %616 = vmatprep.subr.mxu0 %v508_v5 }
  0x58   :  { %138 = vadd.xlane.f32.xlu1 %v137_v41 }
  0x59   :  { %126 = vadd.xlane.f32.xlu0 %v125_v42 }
  0x5c   :  { %141 = vadd.xlane.f32.xlu1 %v140_v47  ;;  %v304_v47 = vld [vmem:[#allocation9 + $0x30] sm:$0xff] }
  0x5d   :  { %129 = vadd.xlane.f32.xlu0 %v128_v48 }
  0xc9   :  { %v234_v2 = vpop.xlane.xlu1 %233 }
  0xca   :  { %v222_v3 = vpop.xlane.xlu0 %221  ;;  %v274_v19 = vrot.slane %v234_v2, %v155_v12  ;;  %v298_v2 = vld [vmem:[#allocation9] sm:$0xff] }
  0xcb   :  { %v255_v21 = vrot.slane %v222_v3, %v155_v12 }
  0xcd   :  { %v237_v7 = vpop.xlane.xlu1 %236 }
  0xce   :  { %v225_v9 = vpop.xlane.xlu0 %224  ;;  %v278_v14 = vrot.slane %v237_v7, %v160_v8  ;;  %v492_v7 = vld [vmem:[#allocation12 + $0x60] sm:$0xff] }
  0xcf   :  { %v259_v17 = vrot.slane %v225_v9, %v160_v8  ;;  %617 = vmatpush3.msra.mxu0 %v492_v7  ;;  %v491_v9 = vld [vmem:[#allocation12 + $0x58] sm:$0xff] }
  0xd0   :  { %v279_v23 = vsel %vm162_vm1, %v278_v14, %v274_v19  ;;  %v504_v14 = vld [vmem:[#allocation12 + $0xc0] sm:$0xff]  ;;  %v486_v19 = vld [vmem:[#allocation12 + $0x30] sm:$0xff] }
  0xd1   :  { %v240_v13 = vpop.xlane.xlu1 %239  ;;  %v260_v26 = vsel %vm162_vm1, %v259_v17, %v255_v21  ;;  %v487_v17 = vld [vmem:[#allocation12 + $0x38] sm:$0xff]  ;;  %v485_v21 = vld [vmem:[#allocation12 + $0x28] sm:$0xff] }
  0xd2   :  { %v228_v15 = vpop.xlane.xlu0 %227  ;;  %v283_v18 = vrot.slane %v240_v13, %v167_v11  ;;  %v489_v13 = vld [vmem:[#allocation12 + $0x48] sm:$0xff] }
  0xd3   :  { %v264_v20 = vrot.slane %v228_v15, %v167_v11  ;;  %v488_v15 = vld [vmem:[#allocation12 + $0x40] sm:$0xff] }
  0xd4   :  { %v284_v27 = vsel %vm169_vm2, %v283_v18, %v279_v23  ;;  %v502_v18 = vld [vmem:[#allocation12 + $0xb0] sm:$0xff]  ;;  %v484_v23 = vld [vmem:[#allocation12 + $0x20] sm:$0xff] }
  0xd5   :  { %v243_v22 = vpop.xlane.xlu1 %242  ;;  %v265_v29 = vsel %vm169_vm2, %v264_v20, %v260_v26  ;;  %v501_v20 = vld [vmem:[#allocation12 + $0xa8] sm:$0xff]  ;;  %v498_v26 = vld [vmem:[#allocation12 + $0x90] sm:$0xff] }
  0xd6   :  { %v288_v24 = vrot.slane %v243_v22, %v174_v16  ;;  %v231_v25 = vpop.xlane.xlu0 %230  ;;  %v500_v22 = vld [vmem:[#allocation12 + $0xa0] sm:$0xff] }
  0xd7   :  { %v269_v28 = vrot.slane %v231_v25, %v174_v16  ;;  %v483_v25 = vld [vmem:[#allocation12 + $0x18] sm:$0xff] }
  0xd8   :  { %v289_v30 = vsel %vm176_vm3, %v288_v24, %v284_v27  ;;  %v499_v24 = vld [vmem:[#allocation12 + $0x98] sm:$0xff]  ;;  %v482_v27 = vld [vmem:[#allocation12 + $0x10] sm:$0xff] }
  0xd9   :  { %v270_v32 = vsel %vm176_vm3, %v269_v28, %v265_v29  ;;  %v124_v33 = vpop.xlane.xlu1 %123  ;;  %v497_v28 = vld [vmem:[#allocation12 + $0x88] sm:$0xff] }
  0xda   :  { %v290_v34 = vsel %vm197_vm4, %v289_v30, %v270_v32  ;;  %v121_v35 = vpop.xlane.xlu0 %120  ;;  %v161_v44 = vrot.slane %v124_v33, %v160_v8  ;;  %v481_v29 = vld [vmem:[#allocation12 + $0x8] sm:$0xff]  ;;  %v496_v30 = vld [vmem:[#allocation12 + $0x80] sm:$0xff]  ;;  %v468_v33 = vsub.s32 0, %v867_v6 }
  0xdb   :  { %v292_v36 = vadd.f32 %v290_v34, %v203_v31  ;;  %v156_v45 = vrot.slane %v121_v35, %v155_v12  ;;  %v480_v31 = vld [vmem:[#allocation12] sm:$0xff]  ;;  %v464_v34 = vld [vmem:[%s907_s4] sm:$0x3]  ;;  %v472_v35 = vsub.s32 1, %v867_v6  ;;  %s794_s4 = smov [#allocation13]  }
  0xdc   :  { %s596_s29 = sshll.u32 %s794_s4, 4  ;;  %s597_s29 = int_to_ptr.vmem [resolvable:$true] %s596_s29 }
  0xdd   :  { %v136_v37 = vpop.xlane.xlu1 %135  ;;  %293 = vst.msk [vmem:[#allocation3] sm:$0x3] %vm99_vm0, %v292_v36  ;;  %v163_v57 = vsel %vm162_vm1, %v161_v44, %v156_v45  ;;  %s756_s30 = scalar_lea.vmem %s597_s29, 32  ;;  %p761_p12 = scmp.lt.s32.totalorder %s597_s29, %s597_s29 }
  0xde   :  { %v133_v38 = vpop.xlane.xlu0 %132  ;;  %v185_v41 = vrot.slane %v136_v37, %v160_v8  ;;  %v507_v8 = vld [vmem:[#allocation12 + $0xd8] sm:$0xff]  ;;  %p757_p11 = scmp.ne.s32.totalorder %s597_s29, %s756_s30  ;;  %p762_p13 = scmp.lt.s32.totalorder %s756_s30, %s756_s30 }
  0xdf   :  { %v181_v42 = vrot.slane %v133_v38, %v155_v12  ;;  %618 = vmatprep.subr.mxu0 %v507_v8  ;;  %v505_v12 = vld [vmem:[#allocation12 + $0xc8] sm:$0xff]  ;;  %v469_v38 = vrot.slane %v464_v34, %v468_v33 }
  0xe0   :  { %619 = vmatpush3.msra.mxu0 %v491_v9  ;;  %p763_p0 = por %p762_p13, %p761_p12 }
  0xe1   :  { %v139_v39 = vpop.xlane.xlu1 %138  ;;  %v186_v53 = vsel %vm162_vm1, %v185_v41, %v181_v42  ;;  %620 = vmatprep.subr.mxu0 %v506_v10  ;;  %v473_v41 = vrot.slane %v464_v34, %v472_v35 }
  0xe2   :  { %v127_v43 = vpop.xlane.xlu0 %126  ;;  %v190_v46 = vrot.slane %v139_v39, %v167_v11  ;;  %p764_p1 = pnand %p763_p0, %p757_p11 }
  0xe3   :  { %v168_v48 = vrot.slane %v127_v43, %v167_v11  ;;  %v490_v11 = vld [vmem:[#allocation12 + $0x50] sm:$0xff] }
  0xe4   :  { %v306_v49 = vld [vmem:[#allocation3] sm:$0x3]  ;;  %v191_v58 = vsel %vm169_vm2, %v190_v46, %v186_v53  ;;  %621 = vmatpush3.msra.mxu0 %v490_v11 }
  0xe5   :  { %607 = vmatmul.mubr.msk.f32.vlgmr.msra.gmra.mxu1 %vm315_vm5, %v306_v49  ;;  %v142_v51 = vpop.xlane.xlu1 %141  ;;  %v170_v61 = vsel %vm169_vm2, %v168_v48, %v163_v57  ;;  %622 = vmatprep.subr.mxu0 %v505_v12  ;;  %v609_v49 = vld [vmem:[%s909_s6] ss:$0 sm:$0xff] }
  0xe6   :  { %v195_v54 = vrot.slane %v142_v51, %v174_v16  ;;  %v130_v55 = vpop.xlane.xlu0 %129  ;;  %418 = vmatpush1.msra.mxu1 %v304_v47  ;;  %457 = vmatprep.mubr.f32.mxu1 %v793_v40 }
  0xe7   :  { %v175_v59 = vrot.slane %v130_v55, %v174_v16  ;;  %419 = vmatprep.subr.mxu1 %v303_v50  ;;  %623 = vmatpush3.msra.mxu0 %v489_v13  ;;  %v503_v16 = vld [vmem:[#allocation12 + $0xb8] sm:$0xff] }
  0xe8   :  { %v196_v62 = vsel %vm176_vm3, %v195_v54, %v191_v58  ;;  %420 = vmatpush1.msra.mxu1 %v302_v52  ;;  %624 = vmatprep.subr.mxu0 %v504_v14 }
  0xe9   :  { %v177_v1 = vsel %vm176_vm3, %v175_v59, %v170_v61  ;;  %421 = vmatprep.subr.mxu1 %v301_v56  ;;  %625 = vmatpush3.msra.mxu0 %v488_v15 }
  0xea   :  { %v198_v40 = vsel %vm197_vm4, %v196_v62, %v177_v1  ;;  %422 = vmatpush1.msra.mxu1 %v300_v60  ;;  %626 = vmatprep.subr.mxu0 %v503_v16 }
  0xeb   :  { %v200_v3 = vadd.f32 %v198_v40, %v102_v63  ;;  %423 = vmatprep.subr.mxu1 %v299_v0  ;;  %627 = vmatpush3.msra.mxu0 %v487_v17 }
  0xec   :  { %424 = vmatpush1.msra.mxu1 %v298_v2  ;;  %628 = vmatprep.subr.mxu0 %v502_v18 }
  0xed   :  { %202 = vst.msk [vmem:[#allocation2] sm:$0x3] %vm99_vm0, %v200_v3  ;;  %629 = vmatpush3.msra.mxu0 %v486_v19 }
  0xee   :  { %630 = vmatprep.subr.mxu0 %v501_v20 }
  0xef   :  { %631 = vmatpush3.msra.mxu0 %v485_v21 }
  0xf0   :  { %632 = vmatprep.subr.mxu0 %v500_v22 }
  0xf1   :  { %633 = vmatpush3.msra.mxu0 %v484_v23 }
  0xf2   :  { %634 = vmatprep.subr.mxu0 %v499_v24 }
  0xf3   :  { %635 = vmatpush3.msra.mxu0 %v483_v25 }
  0xf4   :  { %v297_v4 = vld [vmem:[#allocation2] sm:$0x3]  ;;  %636 = vmatprep.subr.mxu0 %v498_v26 }
  0xf5   :  { %608 = vmatmul.mubr.msk.f32.vlgmr.msra.gmra.mxu1 %vm315_vm5, %v297_v4  ;;  %637 = vmatpush3.msra.mxu0 %v482_v27 }
  0xf6   :  { %638 = vmatprep.subr.mxu0 %v497_v28 }
  0xf7   :  { %639 = vmatpush3.msra.mxu0 %v481_v29 }
  0xf8   :  { %640 = vmatprep.subr.mxu0 %v496_v30 }
  0xf9   :  { %641 = vmatpush3.msra.mxu0 %v480_v31 }
 0x1a5   :  { %v385_v32 = vpop.f32.mrf.mxu1 }
 0x1a7   :  { %v387_v36 = vpop.f32.mrf.mxu1 }
 0x1b5   :  { %v459_v37 = vpop.f32.mrf.mxu1 }
 0x1b6   :  { %v460_v39 = vadd.f32 %v459_v37, %v385_v32 }
 0x1b7   :  { %v461_v42 = vpop.f32.mrf.mxu1 }
 0x1b8   :  { %v462_v43 = vadd.f32 %v461_v42, %v387_v36  ;;  %v476_v44 = vadd.f32 %v469_v38, %v460_v39 }
 0x1ba   :  { %v477_v45 = vadd.f32 %v473_v41, %v462_v43  ;;  %v478_v47 = vmax.f32 %v476_v44, 0.0 }
 0x1bc   :  { %v479_v46 = vmax.f32 %v477_v45, 0.0 }
 0x1be   :  { %583 = vmatprep.mubr.f32.mxu0 %v479_v46 }
 0x1bf   :  { %584 = vmatmul.mubr.f32.vlgmr.msra.gmra.mxu0 %v478_v47 }
 0x27f   :  { %v642_v48 = vpop.f32.mrf.mxu0 }
 0x281   :  { %v643_v50 = vpop.f32.mrf.mxu0 }
 0x282   :  { %v644_v6 = vadd.f32 %v643_v50, %v642_v48 }
 0x284   :  { %v586_v51 = vadd.f32 %v644_v6, %v609_v49 }
 0x286   :  { %589 = vst [vmem:[#allocation13] sm:$0x3] %v586_v51 }
 0x287   :  { %767 = shalt.err (!%p764_p1)
}
 0x288   :  { %599 = dma.vmem_to_hbm [thread:$0]  %s597_s29, 32, %s910_s7, [#allocation6]  }
 0x289   :  { %782 = dma.done.wait [#allocation6], 32  }
 0x28a   :  { %783 = vsyncadd [#allocation6], 4294967264 }
 0x28b   :  { %603 = vsyncpa [#allocation5], 1 }
 0x28c   :  { %604 = vsyncpa [#allocation8], 1 }
 0x28d   :  { %605 = vsyncpa [#allocation11], 1 }
 0x28e   :  { %606 = vsyncpa [#allocation6], 1 }

</bundles_post_ra>
